<compile_context>
chip_gen: v6e
topology: v6e:2x2x1
jax: 0.10.0
libtpu: 0.0.40
codegen_flags: <defaults>
</compile_context>

<pallas_src>
import functools
import math

import jax
import jax.numpy as jnp
from jax.experimental import pallas as pl
from jax.experimental.pallas import tpu as pltpu


def _round_up(a, b):
    return ((a + b - 1) // b) * b


def _cdiv(a, b):
    return (a + b - 1) // b


def _xlogx(p):
    return p * math.log(p) if p > 0.0 else 0.0


def _vmem_capacity_bytes():
    try:
        info = pltpu.get_tpu_info()
        cap = getattr(info, "vmem_capacity_bytes", None)
        if cap:
            return int(cap)
    except Exception:
        pass
    return 64 * 1024 * 1024  # conservative (v7x physical VMEM per TC)


def _label_smoothing_kernel(x_ref, tgt_ref, out_ref, acc_ref, *,
                            padding_idx, confidence, smooth_val, ent_per_row,
                            col_tile, pad_block, size, needs_col_mask):
    """Grid = (row blocks, vocab blocks). One step handles a (TM, TV) tile."""
    j = pl.program_id(1)
    nj = pl.num_programs(1)

    @pl.when(j == 0)
    def _init():
        acc_ref[...] = jnp.zeros_like(acc_ref)

    x = x_ref[...].astype(jnp.float32)                 # (TM, TV) log-probs
    tgt = tgt_ref[...]                                 # (TM, 1) int32 targets
    tm, tv = x.shape

    # Local lane (column-within-tile) index; compared against *shifted* scalars /
    # (TM,1) columns so no per-vreg global-column add is needed.
    lane = jax.lax.broadcasted_iota(jnp.int32, (tm, tv), 1)

    row_valid = tgt != padding_idx                     # (TM, 1) bool
    # Padding rows: weight 0 everywhere; remap their target to -1 so the
    # confidence column can never match (tgt_local stays negative).
    tgt_eff = jnp.where(row_valid, tgt, -1)            # (TM, 1)
    tgt_local = tgt_eff - j * col_tile                 # (TM, 1), cheap scalar-ish op
    smooth_row = jnp.where(row_valid, jnp.float32(smooth_val), jnp.float32(0.0))

    if needs_col_mask:
        # Last vocab block may extend past `size`: zero x on out-of-range lanes
        # (select, so garbage/NaN in the padded region cannot propagate).
        x = jnp.where(lane < (jnp.int32(size) - j * col_tile), x, jnp.float32(0.0))

    def _accumulate(zero_padding_col):
        w = jnp.where(lane == tgt_local, jnp.float32(confidence), smooth_row)
        if zero_padding_col:
            # Only traced for the single block that can hold padding_idx; the
            # comparand is a compile-time constant inside this branch.
            pad_local = padding_idx - pad_block * col_tile
            w = jnp.where(lane == pad_local, jnp.float32(0.0), w)
        contrib = w * x                                # (TM, TV): the -t*x stream
        # Lane-preserving reduce over row groups; plain VPU adds into scratch.
        acc_ref[...] += jnp.sum(contrib.reshape(tm // 8, 8, tv), axis=0)

    if pad_block >= 0:
        @pl.when(j == pad_block)
        def _with_pad_col():
            _accumulate(True)

        @pl.when(j != pad_block)
        def _without_pad_col():
            _accumulate(False)
    else:
        # padding_idx outside [0, size): no column is ever zeroed.
        _accumulate(False)

    @pl.when(j == nj - 1)
    def _finalize():
        # Entropy term is a fixed constant per valid row (no per-element log).
        n_valid = jnp.sum(row_valid.astype(jnp.float32))
        total = jnp.float32(ent_per_row) * n_valid - jnp.sum(acc_ref[...])
        sub = jax.lax.broadcasted_iota(jnp.int32, (8, 128), 0)
        ln = jax.lax.broadcasted_iota(jnp.int32, (8, 128), 1)
        out_ref[...] = jnp.where((sub == 0) & (ln == 0), total, jnp.float32(0.0))


def label_smoothing_loss(x, target, *, size, padding_idx, smoothing,
                         row_tile=None, col_tile=None):
    """x: (N, size) float log-probs (f32 or bf16); target: (N,) int class ids.

    Returns the scalar KLDivLoss(reduction='sum') against the smoothed targets.
    """
    n, v = x.shape
    assert v == size, "x.shape[1] must equal size"

    itemsize = jnp.dtype(x.dtype).itemsize
    align = 16 if itemsize < 4 else 8       # bf16 native (16,128) tiles

    # ---- column (vocab) tile: lane-aligned; last block masked if V % tile != 0 ----
    if col_tile is None:
        if v % 128 == 0 and v <= 8192:
            col_tile = v
        else:
            col_tile = 4096
            for c in (4096, 2048, 1024, 512):
                if v % c == 0:
                    col_tile = c
                    break
        col_tile = min(col_tile, _round_up(v, 128))
    assert col_tile == v or col_tile % 128 == 0
    needs_col_mask = (v % col_tile) != 0
    n_col_blocks = _cdiv(v, col_tile)

    # ---- VMEM budget: query the chip, set an explicit scoped limit ----
    vmem_cap = _vmem_capacity_bytes()
    vmem_limit = min((vmem_cap * 3) // 4, 96 * 1024 * 1024)
    x_budget = vmem_limit // 2               # for the 2 pipeline buffers of x

    # ---- row tile: large, aligned, within budget, and >=2 blocks when possible
    # so the "parallel" row axis can shard across v7x's two TensorCores. ----
    if row_tile is None:
        row_tile = 1024
        while row_tile > align and 2 * row_tile * col_tile * itemsize > x_budget:
            row_tile //= 2
        row_tile = max(row_tile, align)
        half = _round_up(_cdiv(n, 2), align)
        row_tile = min(row_tile, max(align, half))
    assert row_tile % align == 0, (row_tile, align)

    # Pad rows up to a multiple of the row tile; padded rows use
    # target == padding_idx so they contribute exactly zero to the loss.
    n_pad = _round_up(n, row_tile)
    if n_pad != n:
        x = jnp.pad(x, ((0, n_pad - n), (0, 0)))
        target = jnp.pad(target, (0, n_pad - n), constant_values=padding_idx)

    tgt2d = target.astype(jnp.int32).reshape(n_pad, 1)
    n_row_blocks = n_pad // row_tile

    confidence = 1.0 - smoothing
    smooth_val = smoothing / (size - 1)
    pad_in_vocab = 0 <= padding_idx < size
    # Per-valid-row entropy: confidence at the target column, smoothing/(size-1)
    # at the remaining smooth columns (padding column zeroed only if in range).
    n_smooth_cols = (size - 2) if pad_in_vocab else (size - 1)
    ent_per_row = _xlogx(confidence) + n_smooth_cols * _xlogx(smooth_val)
    pad_block = (padding_idx // col_tile) if pad_in_vocab else -1

    kernel = functools.partial(
        _label_smoothing_kernel, padding_idx=padding_idx,
        confidence=confidence, smooth_val=smooth_val, ent_per_row=ent_per_row,
        col_tile=col_tile, pad_block=pad_block, size=size,
        needs_col_mask=needs_col_mask)

    cost = pl.CostEstimate(
        flops=int(5 * n_pad * n_col_blocks * col_tile),
        transcendentals=0,
        bytes_accessed=int(n_pad * v * itemsize + n_pad * 4
                           + n_row_blocks * 8 * 128 * 4))

    partials = pl.pallas_call(
        kernel,
        out_shape=jax.ShapeDtypeStruct((n_row_blocks * 8, 128), jnp.float32),
        grid_spec=pltpu.PrefetchScalarGridSpec(
            num_scalar_prefetch=0,
            grid=(n_row_blocks, n_col_blocks),
            in_specs=[
                pl.BlockSpec((row_tile, col_tile), lambda i, j: (i, j)),
                pl.BlockSpec((row_tile, 1), lambda i, j: (i, 0)),
            ],
            out_specs=pl.BlockSpec((8, 128), lambda i, j: (i, 0)),
            scratch_shapes=[pltpu.VMEM((8, col_tile), jnp.float32)],
        ),
        compiler_params=pltpu.CompilerParams(
            dimension_semantics=("parallel", "arbitrary"),
            vmem_limit_bytes=int(vmem_limit)),
        cost_estimate=cost,
    )(x, tgt2d)

    # Each row block wrote its scalar partial at [8*i, 0]; everything else is 0.
    return jnp.sum(partials)


def _reference_loss(x, target, *, size, padding_idx, smoothing):
    """Pure-JAX reference matching the PyTorch module."""
    confidence = 1.0 - smoothing
    smooth_val = smoothing / (size - 1)
    col = jnp.arange(size)[None, :]
    tgt = target[:, None]
    true_dist = jnp.where(col == tgt, confidence, smooth_val)
    true_dist = jnp.where(col == padding_idx, 0.0, true_dist)
    true_dist = jnp.where(tgt == padding_idx, 0.0, true_dist)
    tlogt = jnp.where(true_dist > 0,
                      true_dist * jnp.log(jnp.where(true_dist > 0, true_dist, 1.0)),
                      0.0)
    return jnp.sum(tlogt - true_dist * x.astype(jnp.float32))


if __name__ == "__main__":
    # Module config (as in LabelSmoothing(size, padding_idx, smoothing))
    SIZE = 512
    PADDING_IDX = 0
    SMOOTHING = 0.1

    N = 120  # deliberately not a multiple of the row tile -> exercises row padding

    key = jax.random.PRNGKey(0)
    kx, kt = jax.random.split(key)

    logits = jax.random.normal(kx, (N, SIZE), dtype=jnp.float32)
    x = jax.nn.log_softmax(logits, axis=-1)          # (N, SIZE) log-probs

    target = jax.random.randint(kt, (N,), 0, SIZE, dtype=jnp.int32)
    target = target.at[3].set(PADDING_IDX)           # ensure some padding rows
    target = target.at[10].set(PADDING_IDX)

    ref = _reference_loss(x, target, size=SIZE, padding_idx=PADDING_IDX,
                          smoothing=SMOOTHING)

    # 1) Explicit small tiles: (row, vocab) grid = (2, 2) so the accumulate/flush,
    #    row-padding and padding-column / plain vocab-block branches all run.
    loss = label_smoothing_loss(x, target, size=SIZE, padding_idx=PADDING_IDX,
                                smoothing=SMOOTHING, row_tile=64, col_tile=256)
    loss = jax.block_until_ready(loss)
    assert jnp.allclose(loss, ref, rtol=2e-3, atol=1e-2), (float(loss), float(ref))

    # 2) Auto tile selection (f32): VMEM-sized tiles, >=2 row blocks for megacore.
    loss_auto = label_smoothing_loss(x, target, size=SIZE, padding_idx=PADDING_IDX,
                                     smoothing=SMOOTHING)
    loss_auto = jax.block_until_ready(loss_auto)
    assert jnp.allclose(loss_auto, ref, rtol=2e-3, atol=1e-2), (
        float(loss_auto), float(ref))

    # 3) bf16-fed path (halves HBM traffic for the only large operand); looser tol.
    loss_bf16 = label_smoothing_loss(x.astype(jnp.bfloat16), target, size=SIZE,
                                     padding_idx=PADDING_IDX, smoothing=SMOOTHING)
    loss_bf16 = jax.block_until_ready(loss_bf16)
    assert jnp.allclose(loss_bf16, ref, rtol=3e-2, atol=0.0), (
        float(loss_bf16), float(ref))

    print("KERNEL_OK")
</pallas_src>

<mosaic_0001>
module attributes {stable_mosaic.version = 11 : i64} {
  func.func @_label_smoothing_kernel(%arg0: i32, %arg1: i32, %arg2: memref<64x256xf32, #tpu.memory_space<vmem>>, %arg3: memref<64x1xi32, #tpu.memory_space<vmem>>, %arg4: memref<8x128xf32, #tpu.memory_space<vmem>>, %arg5: memref<8x256xf32, #tpu.memory_space<vmem>>) attributes {dimension_semantics = [#tpu.dimension_semantics<parallel>, #tpu.dimension_semantics<arbitrary>], iteration_bounds = array<i64: 2, 2>, scalar_prefetch = 0 : i64, scratch_operands = 1 : i64, tpu.core_type = #tpu.core_type<tc>, window_params = [{transform_indices = @transform_0, window_bounds = array<i64: 64, 256>}, {transform_indices = @transform_1, window_bounds = array<i64: 64, 1>}, {transform_indices = @transform_2, window_bounds = array<i64: 8, 128>}]} {
    %c0_i32 = arith.constant 0 : i32
    %0 = arith.cmpi eq, %arg1, %c0_i32 : i32
    %1 = arith.extui %0 : i1 to i32
    %c0_i32_0 = arith.constant 0 : i32
    %2 = arith.cmpi ne, %1, %c0_i32_0 : i32
    scf.if %2 {
      %cst_11 = arith.constant 0.000000e+00 : f32
      %25 = vector.broadcast %cst_11 : f32 to vector<8x256xf32>
      %c0_12 = arith.constant 0 : index
      %c0_13 = arith.constant 0 : index
      %26 = vector.load %arg5[%c0_12, %c0_13] : memref<8x256xf32, #tpu.memory_space<vmem>>, vector<8x256xf32>
      tpu.vector_store %arg5[%c0_12, %c0_13], %25 {strides = array<i32>} : memref<8x256xf32, #tpu.memory_space<vmem>>, vector<8x256xf32>,
    } else {
    }
    %c0 = arith.constant 0 : index
    %c0_1 = arith.constant 0 : index
    %3 = vector.load %arg2[%c0, %c0_1] : memref<64x256xf32, #tpu.memory_space<vmem>>, vector<64x256xf32>
    %c0_2 = arith.constant 0 : index
    %c0_3 = arith.constant 0 : index
    %4 = vector.load %arg3[%c0_2, %c0_3] : memref<64x1xi32, #tpu.memory_space<vmem>>, vector<64x1xi32>
    %5 = tpu.iota {dimensions = array<i32: 1>} : vector<64x256xi32>
    %c0_i32_4 = arith.constant 0 : i32
    %6 = vector.broadcast %c0_i32_4 : i32 to vector<64x1xi32>
    %7 = arith.cmpi ne, %4, %6 : vector<64x1xi32>
    %c-1_i32 = arith.constant -1 : i32
    %8 = vector.broadcast %c-1_i32 : i32 to vector<64x1xi32>
    %9 = arith.select %7, %4, %8 : vector<64x1xi1>, vector<64x1xi32>
    %c256_i32 = arith.constant 256 : i32
    %10 = arith.muli %arg1, %c256_i32 : i32
    %11 = vector.broadcast %10 : i32 to vector<64x1xi32>
    %12 = arith.subi %9, %11 : vector<64x1xi32>
    %cst = arith.constant 1.95694724E-4 : f32
    %cst_5 = arith.constant 0.000000e+00 : f32
    %13 = vector.broadcast %cst : f32 to vector<64x1xf32>
    %14 = vector.broadcast %cst_5 : f32 to vector<64x1xf32>
    %15 = arith.select %7, %13, %14 : vector<64x1xi1>, vector<64x1xf32>
    %c0_i32_6 = arith.constant 0 : i32
    %16 = arith.cmpi eq, %arg1, %c0_i32_6 : i32
    %17 = arith.extui %16 : i1 to i32
    %c0_i32_7 = arith.constant 0 : i32
    %18 = arith.cmpi ne, %17, %c0_i32_7 : i32
    scf.if %18 {
      %25 = vector.broadcast %12 : vector<64x1xi32> to vector<64x256xi32>
      %26 = arith.cmpi eq, %5, %25 : vector<64x256xi32>
      %cst_11 = arith.constant 0.899999976 : f32
      %27 = vector.broadcast %cst_11 : f32 to vector<64x256xf32>
      %28 = vector.shape_cast %15 : vector<64x1xf32> to vector<64x1xf32>
      %29 = vector.broadcast %28 : vector<64x1xf32> to vector<64x256xf32>
      %30 = arith.select %26, %27, %29 : vector<64x256xi1>, vector<64x256xf32>
      %c0_i32_12 = arith.constant 0 : i32
      %31 = vector.broadcast %c0_i32_12 : i32 to vector<64x256xi32>
      %32 = arith.cmpi eq, %5, %31 : vector<64x256xi32>
      %cst_13 = arith.constant 0.000000e+00 : f32
      %33 = vector.broadcast %cst_13 : f32 to vector<64x256xf32>
      %34 = arith.select %32, %33, %30 : vector<64x256xi1>, vector<64x256xf32>
      %35 = arith.mulf %34, %3 : vector<64x256xf32>
      %c0_14 = arith.constant 0 : index
      %c0_15 = arith.constant 0 : index
      %36 = vector.load %arg5[%c0_14, %c0_15] : memref<8x256xf32, #tpu.memory_space<vmem>>, vector<8x256xf32>
      %37 = vector.shape_cast %35 : vector<64x256xf32> to vector<8x8x256xf32>
      %cst_16 = arith.constant dense<0.000000e+00> : vector<8x256xf32>
      %38 = vector.multi_reduction <add>, %37, %cst_16 [0] : vector<8x8x256xf32> to vector<8x256xf32>
      %39 = arith.addf %36, %38 : vector<8x256xf32>
      %c0_17 = arith.constant 0 : index
      %c0_18 = arith.constant 0 : index
      %40 = vector.load %arg5[%c0_17, %c0_18] : memref<8x256xf32, #tpu.memory_space<vmem>>, vector<8x256xf32>
      tpu.vector_store %arg5[%c0_17, %c0_18], %39 {strides = array<i32>} : memref<8x256xf32, #tpu.memory_space<vmem>>, vector<8x256xf32>,
    } else {
    }
    %c0_i32_8 = arith.constant 0 : i32
    %19 = arith.cmpi ne, %arg1, %c0_i32_8 : i32
    %20 = arith.extui %19 : i1 to i32
    %c0_i32_9 = arith.constant 0 : i32
    %21 = arith.cmpi ne, %20, %c0_i32_9 : i32
    scf.if %21 {
      %25 = vector.broadcast %12 : vector<64x1xi32> to vector<64x256xi32>
      %26 = arith.cmpi eq, %5, %25 : vector<64x256xi32>
      %cst_11 = arith.constant 0.899999976 : f32
      %27 = vector.broadcast %cst_11 : f32 to vector<64x256xf32>
      %28 = vector.shape_cast %15 : vector<64x1xf32> to vector<64x1xf32>
      %29 = vector.broadcast %28 : vector<64x1xf32> to vector<64x256xf32>
      %30 = arith.select %26, %27, %29 : vector<64x256xi1>, vector<64x256xf32>
      %31 = arith.mulf %30, %3 : vector<64x256xf32>
      %c0_12 = arith.constant 0 : index
      %c0_13 = arith.constant 0 : index
      %32 = vector.load %arg5[%c0_12, %c0_13] : memref<8x256xf32, #tpu.memory_space<vmem>>, vector<8x256xf32>
      %33 = vector.shape_cast %31 : vector<64x256xf32> to vector<8x8x256xf32>
      %cst_14 = arith.constant dense<0.000000e+00> : vector<8x256xf32>
      %34 = vector.multi_reduction <add>, %33, %cst_14 [0] : vector<8x8x256xf32> to vector<8x256xf32>
      %35 = arith.addf %32, %34 : vector<8x256xf32>
      %c0_15 = arith.constant 0 : index
      %c0_16 = arith.constant 0 : index
      %36 = vector.load %arg5[%c0_15, %c0_16] : memref<8x256xf32, #tpu.memory_space<vmem>>, vector<8x256xf32>
      tpu.vector_store %arg5[%c0_15, %c0_16], %35 {strides = array<i32>} : memref<8x256xf32, #tpu.memory_space<vmem>>, vector<8x256xf32>,
    } else {
    }
    %c1_i32 = arith.constant 1 : i32
    %22 = arith.cmpi eq, %arg1, %c1_i32 : i32
    %23 = arith.extui %22 : i1 to i32
    %c0_i32_10 = arith.constant 0 : i32
    %24 = arith.cmpi ne, %23, %c0_i32_10 : i32
    scf.if %24 {
      %25 = arith.extui %7 : vector<64x1xi1> to vector<64x1xi32>
      %26 = arith.sitofp %25 : vector<64x1xi32> to vector<64x1xf32>
      %27 = vector.shape_cast %26 : vector<64x1xf32> to vector<1x64x1xf32>
      %cst_11 = arith.constant dense<0.000000e+00> : vector<1xf32>
      %28 = vector.multi_reduction <add>, %27, %cst_11 [1, 2] : vector<1x64x1xf32> to vector<1xf32>
      %29 = vector.shape_cast %28 : vector<1xf32> to vector<1x1x1xf32>
      %30 = vector.extract %29[0, 0, 0] : f32 from vector<1x1x1xf32>
      %cst_12 = arith.constant -0.947048902 : f32
      %31 = arith.mulf %cst_12, %30 : f32
      %c0_13 = arith.constant 0 : index
      %c0_14 = arith.constant 0 : index
      %32 = vector.load %arg5[%c0_13, %c0_14] : memref<8x256xf32, #tpu.memory_space<vmem>>, vector<8x256xf32>
      %33 = vector.shape_cast %32 : vector<8x256xf32> to vector<1x8x256xf32>
      %cst_15 = arith.constant dense<0.000000e+00> : vector<1xf32>
      %34 = vector.multi_reduction <add>, %33, %cst_15 [1, 2] : vector<1x8x256xf32> to vector<1xf32>
      %35 = vector.shape_cast %34 : vector<1xf32> to vector<1x1x1xf32>
      %36 = vector.extract %35[0, 0, 0] : f32 from vector<1x1x1xf32>
      %37 = arith.subf %31, %36 : f32
      %38 = tpu.iota {dimensions = array<i32: 0>} : vector<8x128xi32>
      %39 = tpu.iota {dimensions = array<i32: 1>} : vector<8x128xi32>
      %c0_i32_16 = arith.constant 0 : i32
      %40 = vector.broadcast %c0_i32_16 : i32 to vector<8x128xi32>
      %41 = arith.cmpi eq, %38, %40 : vector<8x128xi32>
      %c0_i32_17 = arith.constant 0 : i32
      %42 = vector.broadcast %c0_i32_17 : i32 to vector<8x128xi32>
      %43 = arith.cmpi eq, %39, %42 : vector<8x128xi32>
      %44 = arith.andi %41, %43 : vector<8x128xi1>
      %cst_18 = arith.constant 0.000000e+00 : f32
      %45 = vector.broadcast %37 : f32 to vector<8x128xf32>
      %46 = vector.broadcast %cst_18 : f32 to vector<8x128xf32>
      %47 = arith.select %44, %45, %46 : vector<8x128xi1>, vector<8x128xf32>
      %c0_19 = arith.constant 0 : index
      %c0_20 = arith.constant 0 : index
      %48 = vector.load %arg4[%c0_19, %c0_20] : memref<8x128xf32, #tpu.memory_space<vmem>>, vector<8x128xf32>
      tpu.vector_store %arg4[%c0_19, %c0_20], %47 {strides = array<i32>} : memref<8x128xf32, #tpu.memory_space<vmem>>, vector<8x128xf32>,
    } else {
    }
    return
  }
  func.func @transform_0(%arg0: i32, %arg1: i32) -> (i32, i32) {
    %c0_i32 = arith.constant 0 : i32
    return %arg0, %arg1 : i32, i32
  }
  func.func @transform_1(%arg0: i32, %arg1: i32) -> (i32, i32) {
    %c0_i32 = arith.constant 0 : i32
    %c0_i32_0 = arith.constant 0 : i32
    return %arg0, %c0_i32 : i32, i32
  }
  func.func @transform_2(%arg0: i32, %arg1: i32) -> (i32, i32) {
    %c0_i32 = arith.constant 0 : i32
    %c0_i32_0 = arith.constant 0 : i32
    return %arg0, %c0_i32 : i32, i32
  }
}

</mosaic_0001>

<bundles_post_ra>
// kernel: tpu_custom_call.1
= control target key start
LH: loop header
LB: loop body
LE: loop exit
PB: predicated region body
PF: predicated region fallthrough
CT: control target
= control target key end

     0   :  { %7 = vsyncpa [#allocation4], 0  ;;  %s1563_s0 = inlined_call_operand.hbm [shape: f32[128,512], index: 0, kind: input, shape index: {}]   ;;  %s1564_s1 = inlined_call_operand.vmem [shape: s32[128,1], index: 1, kind: input, shape index: {}]   ;;  %s1565_s2 = inlined_call_operand.hbm [shape: f32[16,128], index: 2, kind: output, shape index: {}]  }
   0x1   :  { %9 = vsyncpa [#allocation4 + $0x1], 0 }
   0x2   :  { %10 = vsyncpa [#allocation5], 0 }
   0x3   :  { %12 = vsyncpa [#allocation5 + $0x1], 0  ;;  %s1061_s9 = smov 0   ;;  %s1063_s10 = smov 0  }
   0x4   :  { %s1065_s11 = smov 0   ;;  %s1067_s12 = smov 0  }
   0x5   :  { %s1069_s13 = smov 0   ;;  %s1071_s14 = smov 0  }
   0x6   :  { %s1073_s15 = smov 0   ;;  %s1075_s16 = smov 0  }
   0x7   :  { %s1077_s17 = smov 0   ;;  %s1079_s18 = smov 0  }
   0x8   :  { %s1081_s19 = smov 0  }
   0x9 LB: > { %1573 = sst [smem:[#allocation9_spill]] %s1030_s18  ;;  %s736_s20 = sadd.s32 4294967295, %s1034_s19   ;;  %s1034_s19 = sphi %s1081_s19, %s18_s19   ;;  %s1030_s18 = sphi %s1079_s18, %s1591_s18   ;;  %s1026_s17 = sphi %s1077_s17, %s1599_s17   ;;  %s1022_s16 = sphi %s1075_s16, %s1589_s16   ;;  %s1018_s15 = sphi %s1073_s15, %s1598_s15   ;;  %s1014_s14 = sphi %s1071_s14, %s1597_s14   ;;  %s1010_s13 = sphi %s1069_s13, %s1596_s13   ;;  %s1006_s12 = sphi %s1067_s12, %s1595_s12   ;;  %s1002_s11 = sphi %s1065_s11, %s1594_s11   ;;  %s998_s10 = sphi %s1063_s10, %s1593_s10   ;;  %s994_s9 = sphi %s1061_s9, %s1592_s9  }
   0xa   : > { %s737_s21 = sadd.s32 4294967294, %s1034_s19   ;;  %s27_s22 = sadd.s32 1, %s1026_s17 }
   0xb   : > { %s30_s23 = sadd.s32 1, %s1030_s18  ;;  %p28_p0 = scmp.ge.s32.totalorder %s27_s22, 2 }
   0xc   : > { %s39_s24 = sadd.s32 1, %s1014_s14  ;;  %p46_p1 = scmp.ne.s32.totalorder %s1014_s14, %s1010_s13 }
   0xd   : > { %p47_p2 = scmp.eq.s32.totalorder %s1034_s19, 0  ;;  %s1601_s22 = smov (%p28_p0, %s27_s22), 0 }
   0xe   : > { %1574 = sst [smem:[#allocation10_spill]] %s1601_s22  ;;  %s1603_s23 = smov (!%p28_p0, %s30_s23), %s1030_s18 }
   0xf   : > { %s35_s25 = ssub.s32 %s1026_s17, %s1601_s22  ;;  %p1127_p3 = por %p47_p2, %p46_p1 }
  0x10   : > { %p32_p4 = scmp.ge.s32.totalorder %s1603_s23, 2  ;;  %p52_p5 = scmp.ne.s32.totalorder %s1010_s13, %s1006_s12 }
  0x11   : > { %p53_p6 = scmp.eq.s32.totalorder %s736_s20, 0  ;;  %s91_s27 = sadd.s32 1, %s1002_s11 }
  0x12   : > { %s1605_s23 = smov (%p32_p4, %s1603_s23), 0  ;;  %p101_p8 = scmp.ne.s32.totalorder %s1002_s11, %s998_s10 }
  0x13   : > { %1576 = sst [smem:[#allocation11_spill]] %s1605_s23  ;;  %p1135_p7 = por %p53_p6, %p52_p5 }
  0x14   : > { %s34_s29 = ssub.s32 %s1030_s18, %s1605_s23  ;;  %p102_p9 = scmp.eq.s32.totalorder %s736_s20, 3 }
  0x15   : > { %s36_s30 = sor.u32 %s35_s25, %s34_s29  ;;  %p89_p10 = scmp.eq.s32.totalorder %s34_s29, 0 }
  0x16   : > { %p37_p11 = scmp.eq.s32.totalorder %s36_s30, 0  ;;  %p1143_p12 = por %p102_p9, %p101_p8 }
  0x17   : > { %s1148_s4 = scalar_select %p89_p10, %s1002_s11, %s91_s27  }
  0x18   : > { %s1151_s5 = scalar_select %p37_p11, %s1014_s14, %s39_s24  }
  0x19   : > { %p107_p13 = scmp.ne.s32.totalorder %s998_s10, %s994_s9  ;;  %p108_p0 = scmp.eq.s32.totalorder %s737_s21, 3 }
  0x1a   : > { %1579 = sst [smem:[#allocation12_spill]] %s1151_s5  ;;  %p784_p1 = scmp.lt.s32.totalorder %s1034_s19, 4 }
  0x1b   : > { %p1156_p2 = por %p108_p0, %p107_p13  ;;  %s128_s7 = sand.u32 1, %s1014_s14  }
  0x1c   : > { %s740_s8 = sshll.u32 %s128_s7, 7  ;;  %s742_s12 = sshll.u32 %s1026_s17, 1 }
  0x1d   : > { %s767_s20 = sshll.u32 %s1030_s18, 5  ;;  %s132_s25 = scalar_lea.vmem [#allocation3], %s740_s8 }
  0x1e   : > { %s142_s29 = sshll.u32 %s132_s25, 4  ;;  %s139_s30 = sadd.s32 %s767_s20, %s742_s12  ;;  %s143_s29 = int_to_ptr.vmem [resolvable:$true] %s142_s29 }
  0x1f   : > { %s744_s27 = sshll.u32 %s139_s30, 7  ;;  %p1165_p4 = pnand %p784_p1, %p1127_p3 }
  0x20   : > { %s141_s22 = scalar_lea.hbm %s1563_s0, %s744_s27  ;;  %p745_p5 = scmp.ge.s32.totalorder %s1034_s19, 1 }
  0x21   : > { %s129_s5 = scalar_lea.sflag [#allocation4], %s128_s7  ;;  %p888_p6 = pneg %p1165_p4 }
  0x22   : > { %s899_s18 = scalar_lea.vmem %s143_s29, 2048  ;;  %s1036_s8 = smov [#allocation3]  }
  0x23   : > { %p900_p8 = scmp.ne.s32.totalorder %s143_s29, %s899_s18  ;;  %s904_s12 = sshll.u32 %s1036_s8, 4  ;;  %s905_s12 = int_to_ptr.vmem [resolvable:$false] %s904_s12 }
  0x24   : > { %s906_s26 = scalar_lea.vmem %s905_s12, 4096  ;;  %p907_p3 = scmp.lt.s32.totalorder %s143_s29, %s905_s12 }
  0x25   : > { %p902_p9 = pnand %p900_p8, %p888_p6  ;;  %p908_p11 = scmp.lt.s32.totalorder %s906_s26, %s899_s18 }
  0x27   : > { %p903_p10 = pneg %p902_p9  ;;  %p909_p13 = por %p908_p11, %p907_p3 }
  0x29   : > { %p910_p0 = pnand %p909_p13, %p903_p10 }
  0x2b   : > { %913 = shalt.err (!%p910_p0)
}
  0x2c   : > { %s1037_s23 = smov 512   ;;  %s1038_s7 = smov 256  }
  0x2d   : > { %s1039_s20 = smov 16   ;;  %p159_p1 = scmp.lt.s32.totalorder %s1034_s19, 5 }
  0x2e   : > { %779 = dma.hbm_to_vmem [thread:$0]  (!%p1165_p4), %s141_s22, 2048, %s143_s29, %s129_s5, %s1037_s23, %s1038_s7, %s1039_s20  }
  0x2f   : > { %p160_p6 = pnand %p745_p5, %p159_p1 }
  0x31   : > { %163 = sbr.rel (%p160_p6) target bundleno = 675 (0x2a3), region = 28 }
  0x36   : > { %s165_s25 = sand.u32 1, %s1010_s13  }
  0x37   : > { %s746_s30 = sshll.u32 %s165_s25, 7  ;;  %s166_s18 = scalar_lea.sflag [#allocation4], %s165_s25 }
  0x38   : > { %s1181_s27 = scalar_lea.vmem [#allocation3], %s746_s30 }
  0x39   : > { %985 = dma.done.wait (%p1135_p7), %s166_s18, 2048  }
  0x3a   : > { %987 = vsyncadd (%p1135_p7), %s166_s18, 4294965248  ;;  %s192_s22 = sand.u32 1, %s998_s10   ;;  %s748_s5 = sshll.u32 %s1022_s16, 3 }
  0x3b   : > { %s1191_s29 = sshll.u32 %s192_s22, 3  ;;  %p198_p4 = scmp.lt.s32.totalorder %s748_s5, 15 }
  0x3c   : > { %s194_s26 = scalar_lea.vmem [#allocation6], %s1191_s29  ;;  %p750_p7 = scmp.ne.s32.totalorder %s1018_s15, 0 }
  0x3d   : > { %s1607_s5 = smov (!%p198_p4, %s748_s5), 15 }
  0x3e   : > { %s749_s24 = sshll.u32 %s1607_s5, 3  ;;  %206 = sbr.rel (%p750_p7) target bundleno = 69 (0x45), region = 36 }
  0x3f   : > { %s1196_s12 = scalar_lea.vmem %s1564_s1, %s749_s24 }
  0x43   : > { %v1040_v0 = vmov 0.0  }
  0x44   : > { %207 = vst [vmem:[#allocation2] sm:$0xff] %v1040_v0  ;;  %208 = vst [vmem:[#allocation2 + $0x8] sm:$0xff] %v1040_v0 }
  0x45 PF: > { %v1203_v1 = vld [vmem:[%s1181_s27] sm:$0xff]  ;;  %v1206_v2 = vld [vmem:[%s1181_s27 + $0x8] sm:$0xff]  ;;  %v1209_v3 = vld [vmem:[%s1181_s27 + $0x10] sm:$0xff]  ;;  %v1570_v4 = vlaneseq  ;;  %s751_s28 = sshll.u32 %s1018_s15, 8  ;;  %v1041_v45 = vmov 0.0  }
  0x46   : > { %v1212_v5 = vld [vmem:[%s1181_s27 + $0x18] sm:$0xff]  ;;  %v1215_v6 = vld [vmem:[%s1181_s27 + $0x20] sm:$0xff]  ;;  %v1218_v7 = vld [vmem:[%s1181_s27 + $0x28] sm:$0xff]  ;;  %v253_v28 = vstv %s751_s28 }
  0x47   : > { %v1221_v8 = vld [vmem:[%s1181_s27 + $0x30] sm:$0xff]  ;;  %v1224_v9 = vld [vmem:[%s1181_s27 + $0x38] sm:$0xff]  ;;  %v1227_v10 = vld [vmem:[%s1181_s27 + $0x40] sm:$0xff]  ;;  %v1230_v11 = vand.u32 127, %v1570_v4 }
  0x48   : > { %v1233_v12 = vld [vmem:[%s1181_s27 + $0x48] sm:$0xff]  ;;  %v1236_v13 = vld [vmem:[%s1181_s27 + $0x50] sm:$0xff]  ;;  %v1239_v14 = vld [vmem:[%s1181_s27 + $0x58] sm:$0xff] }
  0x49   : > { %v1242_v15 = vld [vmem:[%s1181_s27 + $0x60] sm:$0xff]  ;;  %v1245_v16 = vld [vmem:[%s1181_s27 + $0x68] sm:$0xff]  ;;  %v1248_v17 = vld [vmem:[%s1181_s27 + $0x70] sm:$0xff]  ;;  %v1251_v18 = vadd.s32 128, %v1230_v11 }
  0x4a   : > { %v1255_v19 = vld [vmem:[%s1181_s27 + $0x78] sm:$0xff]  ;;  %v1258_v20 = vld [vmem:[%s1196_s12] sm:$0xff]  ;;  %v1264_v22 = vld [vmem:[%s1196_s12 + $0x10] sm:$0xff] }
  0x4b   : > { %v1261_v21 = vld [vmem:[%s1196_s12 + $0x8] sm:$0xff]  ;;  %v1267_v23 = vld [vmem:[%s1196_s12 + $0x18] sm:$0xff]  ;;  %v1270_v24 = vld [vmem:[%s1196_s12 + $0x20] sm:$0xff]  ;;  %vm236_vm0 = vcmp.ne.s32.totalorder %v1258_v20, 0  ;;  %vm238_vm2 = vcmp.ne.s32.totalorder %v1264_v22, 0 }
  0x4c   : > { %vm237_vm1 = vcmp.ne.s32.totalorder %v1261_v21, 0  ;;  %v1275_v25 = vld [vmem:[%s1196_s12 + $0x28] sm:$0xff]  ;;  %v1278_v26 = vld [vmem:[%s1196_s12 + $0x30] sm:$0xff]  ;;  %v1281_v27 = vld [vmem:[%s1196_s12 + $0x38] sm:$0xff]  ;;  %vm239_vm3 = vcmp.ne.s32.totalorder %v1267_v23, 0  ;;  %vm240_vm4 = vcmp.ne.s32.totalorder %v1270_v24, 0 }
  0x4d   : > { %1582 = vst [vmem:[#allocation13_spill] sm:$0xff] %v1278_v26  ;;  %1583 = vst [vmem:[#allocation14_spill] sm:$0xff] %v1281_v27  ;;  %vm241_vm5 = vcmp.ne.s32.totalorder %v1275_v25, 0  ;;  %vm242_vm6 = vcmp.ne.s32.totalorder %v1278_v26, 0  ;;  %vm1569_vm7 = vcmp.ne.s32.totalorder %v1281_v27, 0  ;;  %v244_v29 = vsel %vm236_vm0, %v1258_v20, 4294967295 }
  0x4e   : > { %v245_v30 = vsel %vm237_vm1, %v1261_v21, 4294967295  ;;  %v246_v31 = vsel %vm238_vm2, %v1264_v22, 4294967295  ;;  %v247_v32 = vsel %vm239_vm3, %v1267_v23, 4294967295  ;;  %v248_v33 = vsel %vm240_vm4, %v1270_v24, 4294967295 }
  0x4f   : > { %v249_v34 = vsel %vm241_vm5, %v1275_v25, 4294967295  ;;  %v250_v35 = vsel %vm242_vm6, %v1278_v26, 4294967295  ;;  %v251_v36 = vsel %vm1569_vm7, %v1281_v27, 4294967295  ;;  %v1313_v37 = vsub.s32 %v244_v29, %v253_v28 }
  0x50   : > { %v1315_v38 = vsub.s32 %v245_v30, %v253_v28  ;;  %v1317_v39 = vsub.s32 %v246_v31, %v253_v28  ;;  %v1319_v40 = vsub.s32 %v247_v32, %v253_v28  ;;  %v1321_v41 = vsub.s32 %v248_v33, %v253_v28  ;;  %272 = sbr.rel (%p750_p7) target bundleno = 249 (0xf9), region = 40 }
  0x51   : > { %v1323_v42 = vsub.s32 %v249_v34, %v253_v28  ;;  %v1325_v43 = vsub.s32 %v250_v35, %v253_v28  ;;  %v1327_v44 = vsub.s32 %v251_v36, %v253_v28  ;;  %v1331_v46 = vsel %vm236_vm0, 0.00019569472, %v1041_v45 }
  0x52   : > { %v1335_v47 = vsel %vm237_vm1, 0.00019569472, %v1041_v45  ;;  %v1339_v48 = vsel %vm238_vm2, 0.00019569472, %v1041_v45  ;;  %v1343_v49 = vsel %vm239_vm3, 0.00019569472, %v1041_v45 }
  0x53   : > { %v1347_v50 = vsel %vm240_vm4, 0.00019569472, %v1041_v45  ;;  %v1351_v51 = vsel %vm241_vm5, 0.00019569472, %v1041_v45  ;;  %v1355_v52 = vsel %vm242_vm6, 0.00019569472, %v1041_v45 }
  0x54   : > { %v1359_v53 = vsel %vm1569_vm7, 0.00019569472, %v1041_v45 }
  0x55   : > { %v1042_v54 = vmov 0   ;;  %vm369_vm15 = vcmp.eq.s32.totalorder %v1230_v11, 0 }
  0x56   : > { %883 = vset.pattern.permute.xlu1 %v1042_v54  ;;  %882 = vset.pattern.permute.xlu0 %v1042_v54 }
  0x57   : > { %315 = vperm.xlu1 %883, %v1331_v46   ;;  %274 = vperm.xlu0 %882, %v1313_v37  }
  0x5b   : > { %320 = vperm.xlu1 %883, %v1335_v47   ;;  %277 = vperm.xlu0 %882, %v1315_v38  }
  0x5f   : > { %325 = vperm.xlu1 %883, %v1339_v48   ;;  %280 = vperm.xlu0 %882, %v1317_v39  }
  0x63   : > { %330 = vperm.xlu1 %883, %v1343_v49   ;;  %283 = vperm.xlu0 %882, %v1319_v40  }
  0x67   : > { %335 = vperm.xlu1 %883, %v1347_v50   ;;  %286 = vperm.xlu0 %882, %v1321_v41  }
  0x6b   : > { %340 = vperm.xlu1 %883, %v1351_v51   ;;  %289 = vperm.xlu0 %882, %v1323_v42  }
  0x6f   : > { %345 = vperm.xlu1 %883, %v1355_v52   ;;  %292 = vperm.xlu0 %882, %v1325_v43  }
  0x73   : > { %350 = vperm.xlu1 %883, %v1359_v53   ;;  %295 = vperm.xlu0 %882, %v1327_v44  }
  0xd2   : > { %v316_v55 = vpop.permute.xlu1 %315  ;;  %v275_v56 = vpop.permute.xlu0 %274 }
  0xd3   : > { %vm297_vm10 = vcmp.eq.s32.totalorder %v1230_v11, %v275_v56  ;;  %vm298_vm12 = vcmp.eq.s32.totalorder %v1251_v18, %v275_v56 }
  0xd4   : > { %v353_v28 = vsel %vm297_vm10, 0.9, %v316_v55  ;;  %v354_v30 = vsel %vm298_vm12, 0.9, %v316_v55 }
  0xd5   : > { %v371_v45 = vsel %vm369_vm15, 0.0, %v353_v28  ;;  %v388_v55 = vmul.f32 %v354_v30, %v1206_v2 }
  0xd6   : > { %v321_v57 = vpop.permute.xlu1 %320  ;;  %v278_v58 = vpop.permute.xlu0 %277 }
  0xd7   : > { %vm299_vm8 = vcmp.eq.s32.totalorder %v1230_v11, %v278_v58  ;;  %vm300_vm9 = vcmp.eq.s32.totalorder %v1251_v18, %v278_v58 }
  0xd8   : > { %v355_v61 = vsel %vm299_vm8, 0.9, %v321_v57  ;;  %v356_v0 = vsel %vm300_vm9, 0.9, %v321_v57 }
  0xd9   : > { %v373_v31 = vsel %vm369_vm15, 0.0, %v355_v61  ;;  %v390_v32 = vmul.f32 %v356_v0, %v1212_v5  ;;  %v387_v61 = vmul.f32 %v371_v45, %v1203_v1 }
  0xda   : > { %v326_v59 = vpop.permute.xlu1 %325  ;;  %v281_v60 = vpop.permute.xlu0 %280  ;;  %v389_v56 = vmul.f32 %v373_v31, %v1209_v3 }
  0xdb   : > { %vm301_vm11 = vcmp.eq.s32.totalorder %v1230_v11, %v281_v60  ;;  %vm302_vm13 = vcmp.eq.s32.totalorder %v1251_v18, %v281_v60 }
  0xdc   : > { %v357_v29 = vsel %vm301_vm11, 0.9, %v326_v59  ;;  %v358_v33 = vsel %vm302_vm13, 0.9, %v326_v59 }
  0xdd   : > { %v375_v54 = vsel %vm369_vm15, 0.0, %v357_v29  ;;  %v392_v59 = vmul.f32 %v358_v33, %v1218_v7 }
  0xde   : > { %v331_v62 = vpop.permute.xlu1 %330  ;;  %v284_v63 = vpop.permute.xlu0 %283  ;;  %v391_v0 = vmul.f32 %v375_v54, %v1215_v6 }
  0xdf   : > { %vm303_vm14 = vcmp.eq.s32.totalorder %v1230_v11, %v284_v63  ;;  %vm304_vm7 = vcmp.eq.s32.totalorder %v1251_v18, %v284_v63  ;;  %v412_v63 = vadd.f32 %v390_v32, %v388_v55 }
  0xe0   : > { %v359_v34 = vsel %vm303_vm14, 0.9, %v331_v62  ;;  %v360_v57 = vsel %vm304_vm7, 0.9, %v331_v62  ;;  %v405_v62 = vadd.f32 %v389_v56, %v387_v61 }
  0xe1   : > { %v377_v60 = vsel %vm369_vm15, 0.0, %v359_v34  ;;  %v413_v32 = vadd.f32 %v412_v63, %v392_v59 }
  0xe2   : > { %v336_v35 = vpop.permute.xlu1 %335  ;;  %v287_v36 = vpop.permute.xlu0 %286  ;;  %v393_v31 = vmul.f32 %v377_v60, %v1221_v8  ;;  %v406_v54 = vadd.f32 %v405_v62, %v391_v0 }
  0xe3   : > { %vm305_vm8 = vcmp.eq.s32.totalorder %v1230_v11, %v287_v36  ;;  %vm306_vm9 = vcmp.eq.s32.totalorder %v1251_v18, %v287_v36  ;;  %v394_v36 = vmul.f32 %v360_v57, %v1224_v9 }
  0xe4   : > { %v361_v58 = vsel %vm305_vm8, 0.9, %v336_v35  ;;  %v362_v28 = vsel %vm306_vm9, 0.9, %v336_v35 }
  0xe5   : > { %v379_v30 = vsel %vm369_vm15, 0.0, %v361_v58  ;;  %v396_v45 = vmul.f32 %v362_v28, %v1233_v12  ;;  %v414_v27 = vadd.f32 %v413_v32, %v394_v36 }
  0xe6   : > { %v341_v29 = vpop.permute.xlu1 %340  ;;  %v290_v4 = vpop.permute.xlu0 %289  ;;  %v395_v55 = vmul.f32 %v379_v30, %v1227_v10 }
  0xe7   : > { %vm307_vm7 = vcmp.eq.s32.totalorder %v1230_v11, %v290_v4  ;;  %vm308_vm10 = vcmp.eq.s32.totalorder %v1251_v18, %v290_v4  ;;  %v407_v4 = vadd.f32 %v406_v54, %v393_v31  ;;  %v415_v61 = vadd.f32 %v414_v27, %v396_v45  ;;  %v404_v54 = vld [vmem:[#allocation2 + $0x8] sm:$0xff] }
  0xe8   : > { %v363_v33 = vsel %vm307_vm7, 0.9, %v341_v29  ;;  %v364_v34 = vsel %vm308_vm10, 0.9, %v341_v29 }
  0xe9   : > { %v381_v35 = vsel %vm369_vm15, 0.0, %v363_v33  ;;  %v398_v26 = vmul.f32 %v364_v34, %v1239_v14  ;;  %v408_v28 = vadd.f32 %v407_v4, %v395_v55 }
  0xea   : > { %v346_v57 = vpop.permute.xlu1 %345  ;;  %v293_v58 = vpop.permute.xlu0 %292  ;;  %v397_v56 = vmul.f32 %v381_v35, %v1236_v13 }
  0xeb   : > { %vm309_vm11 = vcmp.eq.s32.totalorder %v1230_v11, %v293_v58  ;;  %vm310_vm12 = vcmp.eq.s32.totalorder %v1251_v18, %v293_v58  ;;  %v416_v62 = vadd.f32 %v415_v61, %v398_v26 }
  0xec   : > { %v365_v59 = vsel %vm309_vm11, 0.9, %v346_v57  ;;  %v366_v60 = vsel %vm310_vm12, 0.9, %v346_v57  ;;  %v409_v31 = vadd.f32 %v408_v28, %v397_v56  ;;  %v403_v57 = vld [vmem:[#allocation2] sm:$0xff] }
  0xed   : > { %v383_v63 = vsel %vm369_vm15, 0.0, %v365_v59  ;;  %v400_v0 = vmul.f32 %v366_v60, %v1245_v16 }
  0xee   : > { %v399_v29 = vmul.f32 %v383_v63, %v1242_v15  ;;  %v351_v36 = vpop.permute.xlu1 %350  ;;  %v296_v30 = vpop.permute.xlu0 %295 }
  0xef   : > { %vm311_vm13 = vcmp.eq.s32.totalorder %v1230_v11, %v296_v30  ;;  %vm312_vm14 = vcmp.eq.s32.totalorder %v1251_v18, %v296_v30  ;;  %v417_v32 = vadd.f32 %v416_v62, %v400_v0 }
  0xf0   : > { %v367_v33 = vsel %vm311_vm13, 0.9, %v351_v36  ;;  %v368_v34 = vsel %vm312_vm14, 0.9, %v351_v36  ;;  %v410_v35 = vadd.f32 %v409_v31, %v399_v29 }
  0xf1   : > { %v385_v27 = vsel %vm369_vm15, 0.0, %v367_v33  ;;  %v402_v45 = vmul.f32 %v368_v34, %v1255_v19 }
  0xf2   : > { %v401_v55 = vmul.f32 %v385_v27, %v1248_v17 }
  0xf3   : > { %v418_v58 = vadd.f32 %v417_v32, %v402_v45 }
  0xf4   : > { %v411_v26 = vadd.f32 %v410_v35, %v401_v55 }
  0xf5   : > { %v420_v4 = vadd.f32 %v418_v58, %v404_v54 }
  0xf6   : > { %v419_v59 = vadd.f32 %v411_v26, %v403_v57 }
  0xf7   : > { %422 = vst [vmem:[#allocation2 + $0x8] sm:$0xff] %v420_v4 }
  0xf8   : > { %421 = vst [vmem:[#allocation2] sm:$0xff] %v419_v59 }
  0xf9 PF: > { %p753_p5 = scmp.eq.s32.totalorder %s1018_s15, 0 }
  0xfb   : > { %426 = sbr.rel (%p753_p5) target bundleno = 419 (0x1a3), region = 44 }
 0x100   : > { %v1043_v56 = vmov 0  }
 0x101   : > { %885 = vset.pattern.permute.xlu1 %v1043_v56  ;;  %884 = vset.pattern.permute.xlu0 %v1043_v56 }
 0x102   : > { %469 = vperm.xlu1 %885, %v1331_v46   ;;  %428 = vperm.xlu0 %884, %v1313_v37  }
 0x106   : > { %474 = vperm.xlu1 %885, %v1335_v47   ;;  %431 = vperm.xlu0 %884, %v1315_v38  }
 0x10a   : > { %479 = vperm.xlu1 %885, %v1339_v48   ;;  %434 = vperm.xlu0 %884, %v1317_v39  }
 0x10e   : > { %484 = vperm.xlu1 %885, %v1343_v49   ;;  %437 = vperm.xlu0 %884, %v1319_v40  }
 0x112   : > { %489 = vperm.xlu1 %885, %v1347_v50   ;;  %440 = vperm.xlu0 %884, %v1321_v41  }
 0x116   : > { %494 = vperm.xlu1 %885, %v1351_v51   ;;  %443 = vperm.xlu0 %884, %v1323_v42  }
 0x11a   : > { %499 = vperm.xlu1 %885, %v1355_v52   ;;  %446 = vperm.xlu0 %884, %v1325_v43  }
 0x11e   : > { %504 = vperm.xlu1 %885, %v1359_v53   ;;  %449 = vperm.xlu0 %884, %v1327_v44  }
 0x17d   : > { %v470_v37 = vpop.permute.xlu1 %469  ;;  %v429_v38 = vpop.permute.xlu0 %428 }
 0x17e   : > { %vm451_vm9 = vcmp.eq.s32.totalorder %v1230_v11, %v429_v38  ;;  %vm452_vm7 = vcmp.eq.s32.totalorder %v1251_v18, %v429_v38 }
 0x17f   : > { %v507_v48 = vsel %vm451_vm9, 0.9, %v470_v37  ;;  %v508_v49 = vsel %vm452_vm7, 0.9, %v470_v37 }
 0x180   : > { %v523_v60 = vmul.f32 %v507_v48, %v1203_v1  ;;  %v524_v61 = vmul.f32 %v508_v49, %v1206_v2 }
 0x181   : > { %v475_v39 = vpop.permute.xlu1 %474  ;;  %v432_v40 = vpop.permute.xlu0 %431 }
 0x182   : > { %vm453_vm15 = vcmp.eq.s32.totalorder %v1230_v11, %v432_v40  ;;  %vm454_vm8 = vcmp.eq.s32.totalorder %v1251_v18, %v432_v40 }
 0x183   : > { %v509_v41 = vsel %vm453_vm15, 0.9, %v475_v39  ;;  %v510_v42 = vsel %vm454_vm8, 0.9, %v475_v39 }
 0x184   : > { %v525_v50 = vmul.f32 %v509_v41, %v1209_v3  ;;  %v526_v51 = vmul.f32 %v510_v42, %v1212_v5 }
 0x185   : > { %v480_v46 = vpop.permute.xlu1 %479  ;;  %v435_v47 = vpop.permute.xlu0 %434 }
 0x186   : > { %vm455_vm10 = vcmp.eq.s32.totalorder %v1230_v11, %v435_v47  ;;  %vm456_vm11 = vcmp.eq.s32.totalorder %v1251_v18, %v435_v47  ;;  %v541_v30 = vadd.f32 %v525_v50, %v523_v60  ;;  %v548_v5 = vadd.f32 %v526_v51, %v524_v61 }
 0x187   : > { %v511_v52 = vsel %vm455_vm10, 0.9, %v480_v46  ;;  %v512_v53 = vsel %vm456_vm11, 0.9, %v480_v46 }
 0x188   : > { %v527_v36 = vmul.f32 %v511_v52, %v1215_v6  ;;  %v528_v3 = vmul.f32 %v512_v53, %v1218_v7 }
 0x189   : > { %v485_v43 = vpop.permute.xlu1 %484  ;;  %v438_v44 = vpop.permute.xlu0 %437 }
 0x18a   : > { %vm457_vm12 = vcmp.eq.s32.totalorder %v1230_v11, %v438_v44  ;;  %vm458_vm13 = vcmp.eq.s32.totalorder %v1251_v18, %v438_v44  ;;  %v542_v32 = vadd.f32 %v541_v30, %v527_v36  ;;  %v549_v27 = vadd.f32 %v548_v5, %v528_v3 }
 0x18b   : > { %v513_v28 = vsel %vm457_vm12, 0.9, %v485_v43  ;;  %v514_v29 = vsel %vm458_vm13, 0.9, %v485_v43  ;;  %v539_v43 = vld [vmem:[#allocation2] sm:$0xff] }
 0x18c   : > { %v529_v62 = vmul.f32 %v513_v28, %v1221_v8  ;;  %v530_v1 = vmul.f32 %v514_v29, %v1224_v9 }
 0x18d   : > { %v490_v63 = vpop.permute.xlu1 %489  ;;  %v441_v0 = vpop.permute.xlu0 %440 }
 0x18e   : > { %vm459_vm14 = vcmp.eq.s32.totalorder %v1230_v11, %v441_v0  ;;  %vm460_vm15 = vcmp.eq.s32.totalorder %v1251_v18, %v441_v0  ;;  %v543_v54 = vadd.f32 %v542_v32, %v529_v62  ;;  %v550_v8 = vadd.f32 %v549_v27, %v530_v1 }
 0x18f   : > { %v515_v31 = vsel %vm459_vm14, 0.9, %v490_v63  ;;  %v516_v2 = vsel %vm460_vm15, 0.9, %v490_v63 }
 0x190   : > { %v531_v7 = vmul.f32 %v515_v31, %v1227_v10  ;;  %v532_v35 = vmul.f32 %v516_v2, %v1233_v12 }
 0x191   : > { %v495_v33 = vpop.permute.xlu1 %494  ;;  %v444_v34 = vpop.permute.xlu0 %443 }
 0x192   : > { %vm461_vm8 = vcmp.eq.s32.totalorder %v1230_v11, %v444_v34  ;;  %vm462_vm9 = vcmp.eq.s32.totalorder %v1251_v18, %v444_v34  ;;  %v544_v59 = vadd.f32 %v543_v54, %v531_v7  ;;  %v551_v56 = vadd.f32 %v550_v8, %v532_v35 }
 0x193   : > { %v517_v45 = vsel %vm461_vm8, 0.9, %v495_v33  ;;  %v518_v6 = vsel %vm462_vm9, 0.9, %v495_v33 }
 0x194   : > { %v533_v57 = vmul.f32 %v517_v45, %v1236_v13  ;;  %v534_v58 = vmul.f32 %v518_v6, %v1239_v14 }
 0x195   : > { %v500_v55 = vpop.permute.xlu1 %499  ;;  %v447_v9 = vpop.permute.xlu0 %446 }
 0x196   : > { %vm463_vm7 = vcmp.eq.s32.totalorder %v1230_v11, %v447_v9  ;;  %vm464_vm10 = vcmp.eq.s32.totalorder %v1251_v18, %v447_v9  ;;  %v545_v39 = vadd.f32 %v544_v59, %v533_v57  ;;  %v552_v40 = vadd.f32 %v551_v56, %v534_v58 }
 0x197   : > { %v519_v26 = vsel %vm463_vm7, 0.9, %v500_v55  ;;  %v520_v4 = vsel %vm464_vm10, 0.9, %v500_v55 }
 0x198   : > { %v535_v10 = vmul.f32 %v519_v26, %v1242_v15  ;;  %v536_v12 = vmul.f32 %v520_v4, %v1245_v16  ;;  %v540_v15 = vld [vmem:[#allocation2 + $0x8] sm:$0xff] }
 0x199   : > { %v505_v37 = vpop.permute.xlu1 %504  ;;  %v450_v38 = vpop.permute.xlu0 %449 }
 0x19a   : > { %vm465_vm11 = vcmp.eq.s32.totalorder %v1230_v11, %v450_v38  ;;  %vm466_vm12 = vcmp.eq.s32.totalorder %v1251_v18, %v450_v38  ;;  %v546_v46 = vadd.f32 %v545_v39, %v535_v10  ;;  %v553_v47 = vadd.f32 %v552_v40, %v536_v12 }
 0x19b   : > { %v521_v13 = vsel %vm465_vm11, 0.9, %v505_v37  ;;  %v522_v14 = vsel %vm466_vm12, 0.9, %v505_v37 }
 0x19c   : > { %v537_v41 = vmul.f32 %v521_v13, %v1248_v17  ;;  %v538_v42 = vmul.f32 %v522_v14, %v1255_v19 }
 0x19e   : > { %v547_v44 = vadd.f32 %v546_v46, %v537_v41  ;;  %v554_v16 = vadd.f32 %v553_v47, %v538_v42 }
 0x1a0   : > { %v555_v48 = vadd.f32 %v547_v44, %v539_v43  ;;  %v556_v49 = vadd.f32 %v554_v16, %v540_v15 }
 0x1a2   : > { %557 = vst [vmem:[#allocation2] sm:$0xff] %v555_v48  ;;  %558 = vst [vmem:[#allocation2 + $0x8] sm:$0xff] %v556_v49 }
 0x1a3 PF: > { %p754_p8 = scmp.ne.s32.totalorder %s1018_s15, 1 }
 0x1a5   : > { %562 = sbr.rel (%p754_p8) target bundleno = 652 (0x28c), region = 48 }
 0x1aa   : > { %vm579_vm13 = vcmask 7168   ;;  %v1044_v18 = vmov 0.0   ;;  %v1585_v3 = vld [vmem:[#allocation14_spill] sm:$0xff]  ;;  %v605_v31 = vld [vmem:[#allocation2] sm:$0xff]  ;;  %v1587_v59 = vlaneseq }
 0x1ab   : > { %v755_v50 = vsel %vm236_vm0, 1.0, %v1044_v18  ;;  %v756_v17 = vsel %vm237_vm1, 1.0, %v1044_v18  ;;  %v757_v19 = vsel %vm238_vm2, 1.0, %v1044_v18  ;;  %v758_v51 = vsel %vm239_vm3, 1.0, %v1044_v18  ;;  %v606_v2 = vld [vmem:[#allocation2 + $0x8] sm:$0xff] }
 0x1ac   : > { %v580_v52 = vsel %vm579_vm13, %v755_v50, 0.0  ;;  %v581_v53 = vsel %vm579_vm13, %v756_v17, 0.0  ;;  %v583_v60 = vsel %vm579_vm13, %v757_v19, 0.0  ;;  %v759_v61 = vsel %vm240_vm4, 1.0, %v1044_v18 }
 0x1ad   : > { %v582_v20 = vadd.f32 %v581_v53, %v580_v52  ;;  %v585_v63 = vsel %vm579_vm13, %v758_v51, 0.0  ;;  %v760_v21 = vsel %vm241_vm5, 1.0, %v1044_v18  ;;  %v587_v0 = vsel %vm579_vm13, %v759_v61, 0.0 }
 0x1ae   : > { %v761_v28 = vsel %vm242_vm6, 1.0, %v1044_v18  ;;  %v589_v36 = vsel %vm579_vm13, %v760_v21, 0.0  ;;  %vm1586_vm0 = vcmp.ne.s32.totalorder %v1585_v3, 0  ;;  %v607_v34 = vadd.f32 %v606_v2, %v605_v31 }
 0x1af   : > { %v584_v22 = vadd.f32 %v583_v60, %v582_v20  ;;  %v762_v30 = vsel %vm1586_vm0, 1.0, %v1044_v18  ;;  %v591_v5 = vsel %vm579_vm13, %v761_v28, 0.0  ;;  %v619_v56 = vshrl.u32 %v1587_v59, 7 }
 0x1b0   : > { %v593_v1 = vsel %vm579_vm13, %v762_v30, 0.0  ;;  %vm621_vm2 = vcmp.eq.s32.totalorder %v1230_v11, 0 }
 0x1b1   : > { %v586_v29 = vadd.f32 %v585_v63, %v584_v22  ;;  %vm620_vm1 = vcmp.eq.s32.totalorder %v619_v56, 0 }
 0x1b2   : > { %vm622_vm3 = vmand %vm620_vm1, %vm621_vm2 }
 0x1b3   : > { %v588_v24 = vadd.f32 %v587_v0, %v586_v29 }
 0x1b5   : > { %v590_v62 = vadd.f32 %v589_v36, %v588_v24 }
 0x1b7   : > { %v592_v25 = vadd.f32 %v591_v5, %v590_v62 }
 0x1b9   : > { %v594_v33 = vadd.f32 %v593_v1, %v592_v25 }
 0x1bb   : > { %595 = vadd.xlane.f32.xlu0 %v594_v33 }
 0x1bf   : > { %608 = vadd.xlane.f32.xlu0 %v607_v34 }
 0x244   : > { %v596_v32 = vpop.xlane.xlu0 %595 }
 0x245   : > { %v597_v27 = vrot.slane %v596_v32, 4 }
 0x247   : > { %v598_v45 = vadd.f32 %v597_v27, %v596_v32 }
 0x248   : > { %v609_v6 = vpop.xlane.xlu0 %608 }
 0x249   : > { %v599_v7 = vrot.slane %v598_v45, 2  ;;  %v610_v35 = vrot.slane %v609_v6, 4 }
 0x24b   : > { %v611_v54 = vadd.f32 %v610_v35, %v609_v6  ;;  %v600_v8 = vadd.f32 %v599_v7, %v598_v45 }
 0x24d   : > { %v612_v55 = vrot.slane %v611_v54, 2  ;;  %v601_v9 = vrot.slane %v600_v8, 1 }
 0x24f   : > { %v613_v57 = vadd.f32 %v612_v55, %v611_v54  ;;  %v602_v58 = vadd.f32 %v601_v9, %v600_v8 }
 0x251   : > { %768 = vpush %v602_v58  ;;  %v614_v26 = vrot.slane %v613_v57, 1 }
 0x253   : > { %v615_v4 = vadd.f32 %v614_v26, %v613_v57 }
 0x255   : > { %770 = vpush %v615_v4 }
 0x282   : > { %s769_s15 = spop %768 }
 0x283   : > { %s604_s23 = smul.f32 -0.9470489, %s769_s15 }
 0x286   : > { %s771_s7 = spop %770 }
 0x287   : > { %s617_s20 = ssub.f32 %s604_s23, %s771_s7 }
 0x289   : > { %v623_v10 = vstv %s617_s20 }
 0x28a   : > { %v624_v12 = vsel %vm622_vm3, %v623_v10, 0.0 }
 0x28b   : > { %625 = vst [vmem:[%s194_s26] sm:$0xff] %v624_v12 }
 0x28c PF: > { %s764_s25 = sshll.u32 %s1022_s16, 7  ;;  %s640_s5 = sshll.u32 %s194_s26, 4  ;;  %s641_s5 = int_to_ptr.vmem [resolvable:$true] %s640_s5 }
 0x28d   : > { %s638_s27 = scalar_lea.hbm %s1565_s2, %s764_s25  ;;  %s627_s24 = scalar_lea.sflag [#allocation5], %s192_s22 }
 0x28e   : > { %s914_s21 = scalar_lea.vmem %s641_s5, 128  ;;  %s1045_s8 = smov [#allocation6]  }
 0x28f   : > { %p915_p9 = scmp.ne.s32.totalorder %s641_s5, %s914_s21  ;;  %s918_s12 = sshll.u32 %s1045_s8, 4  ;;  %s919_s12 = int_to_ptr.vmem [resolvable:$false] %s918_s12 }
 0x290   : > { %s920_s28 = scalar_lea.vmem %s919_s12, 256  ;;  %p921_p11 = scmp.lt.s32.totalorder %s641_s5, %s919_s12 }
 0x291   : > { %p916_p10 = pnand %p915_p9, %p1143_p12  ;;  %p922_p13 = scmp.lt.s32.totalorder %s920_s28, %s914_s21 }
 0x293   : > { %p917_p3 = pneg %p916_p10  ;;  %p923_p0 = por %p922_p13, %p921_p11 }
 0x295   : > { %p924_p1 = pnand %p923_p0, %p917_p3 }
 0x297   : > { %927 = shalt.err (!%p924_p1)
}
 0x298   : > { %s928_s16 = scalar_lea.hbm %s638_s27, 128  ;;  %s932_s26 = scalar_lea.hbm %s1565_s2, 256 }
 0x299   : > { %p929_p6 = scmp.ne.s32.totalorder %s638_s27, %s928_s16  ;;  %p933_p5 = scmp.lt.s32.totalorder %s638_s27, %s1565_s2 }
 0x29a   : > { %p934_p8 = scmp.lt.s32.totalorder %s932_s26, %s928_s16 }
 0x29b   : > { %p930_p4 = pnand %p929_p6, %p1143_p12 }
 0x29c   : > { %p935_p9 = por %p934_p8, %p933_p5 }
 0x29d   : > { %p931_p7 = pneg %p930_p4 }
 0x29f   : > { %p936_p10 = pnand %p935_p9, %p931_p7 }
 0x2a1   : > { %939 = shalt.err (!%p936_p10)
}
 0x2a2   : > { %774 = dma.vmem_to_hbm [thread:$0]  (%p1143_p12), %s641_s5, 128, %s638_s27, %s627_s24  }
 0x2a3 PF: > { %p785_p3 = scmp.ge.s32.totalorder %s1034_s19, 2  ;;  %s652_s7 = sand.u32 1, %s994_s9  }
 0x2a4   : > { %s653_s20 = scalar_lea.sflag [#allocation5], %s652_s7 }
 0x2a5   : > { %p781_p11 = pnand %p785_p3, %p1156_p2 }
 0x2a7   : > { %p782_p13 = pneg %p781_p11 }
 0x2a9   : > { %989 = dma.done.wait (%p782_p13), %s653_s20, 128  }
 0x2aa   : > { %991 = vsyncadd (%p782_p13), %s653_s20, 4294967168  ;;  %s18_s19 = sadd.s32 1, %s1034_s19   ;;  %s1588_s3 = sld [smem:[#allocation12_spill]] }
 0x2ab   : > { %p15_p0 = scmp.ge.s32.totalorder %s18_s19, 6   ;;  %s1589_s16 = sld [smem:[#allocation9_spill]] }
 0x2ac   : > { %s1590_s25 = sld [smem:[#allocation10_spill]]  ;;  %s1592_s9 = smov %s998_s10 }
 0x2ad   : > { %s1591_s18 = sld [smem:[#allocation11_spill]]  ;;  %s1593_s10 = smov %s1002_s11 }
 0x2ae   : > { %s1594_s11 = smov %s1148_s4  ;;  %s1595_s12 = smov %s1010_s13 }
 0x2af   : > { %s1596_s13 = smov %s1014_s14  ;;  %s1598_s15 = smov %s1026_s17 }
 0x2b0   : > { %s1597_s14 = smov %s1588_s3  ;;  %17 = sbr.rel (!%p15_p0) target bundleno = 9 (0x9), region = 92 }
 0x2b2   : > { %s1599_s17 = smov %s1590_s25 }
 0x2b5   :  { %658 = vsyncpa [#allocation4], 1 }
 0x2b6   :  { %660 = vsyncpa [#allocation4 + $0x1], 1 }
 0x2b7   :  { %661 = vsyncpa [#allocation5], 1 }
 0x2b8   :  { %663 = vsyncpa [#allocation5 + $0x1], 1 }

</bundles_post_ra>
